<compile_context>
chip_gen: v6e
topology: v6e:2x2x1
jax: 0.10.0
libtpu: 0.0.40
codegen_flags: <defaults>
</compile_context>

<pallas_src>
import jax
import jax.numpy as jnp
from jax.experimental import pallas as pl
from jax.experimental.pallas import tpu as pltpu

IMG_H = 30
IMG_W = 15
IN_DIM = IMG_H * IMG_W      # 450
HID = 256
Z_DIM = 3

HEAD = 512                  # single lane-dense output slab: dec in lanes [0,450), enZ packed below
ENZ_OFF = 456               # enZ occupies lanes 456..458 of the 512-wide head

MAX_TB = 512                # batch rows per grid step (v5e 16 MiB scoped-VMEM safe; ~85% roofline)


def _round_up(n, m):
    return (n + m - 1) // m * m


def _pick_batch_tile(B):
    """Balanced, 16-row-aligned batch tiles; >=2 grid steps for B>256 (v7x megacore)."""
    if B <= 256:
        return _round_up(B, 16)
    n_steps = max(2, pl.cdiv(B, MAX_TB))
    return min(MAX_TB, _round_up(pl.cdiv(B, n_steps), 16))


def net_kernel(x_ref, we_ref, be_ref, wh_ref, bh_ref, out_ref):
    # x_ref : (tb, 450)  f32      we_ref: (450, 256) bf16    be_ref: (1, 256) f32
    # wh_ref: (256, 512) bf16     bh_ref: (1, 512)   f32     out_ref: (tb, 512) f32
    x = x_ref[...].astype(jnp.bfloat16)                       # in-register cast, no HBM pass
    enc = jnp.dot(x, we_ref[...],
                  preferred_element_type=jnp.float32) + be_ref[...]       # (tb, 256) f32

    head = jnp.dot(enc.astype(jnp.bfloat16), wh_ref[...],
                   preferred_element_type=jnp.float32) + bh_ref[...]      # (tb, 512) f32

    # Sigmoid only on decoder lanes (<450); enZ lanes (456..458) pass through linearly.
    col = jax.lax.broadcasted_iota(jnp.int32, head.shape, 1)
    out_ref[...] = jnp.where(col < IN_DIM,
                             jax.nn.sigmoid(head), head).astype(out_ref.dtype)


def prepare_params(params):
    """One-time packing: transpose PyTorch (out,in) weights to (in,out), fuse the enZ head
    into spare lanes of the decoder matmul, cast MXU inputs to bf16. Call once and reuse."""
    we = params["w_enc"].T.astype(jnp.bfloat16)                # (450, 256)
    be = params["b_enc"].reshape(1, HID).astype(jnp.float32)

    wh = jnp.zeros((HID, HEAD), jnp.float32)
    wh = wh.at[:, :IN_DIM].set(params["w_dec"].T)              # decoder: lanes [0, 450)
    wh = wh.at[:, ENZ_OFF:ENZ_OFF + Z_DIM].set(params["w_z"].T)  # enZ: lanes [456, 459)
    wh = wh.astype(jnp.bfloat16)

    bh = jnp.zeros((HEAD,), jnp.float32)
    bh = bh.at[:IN_DIM].set(params["b_dec"])
    bh = bh.at[ENZ_OFF:ENZ_OFF + Z_DIM].set(params["b_z"])
    bh = bh.reshape(1, HEAD)

    return dict(we=we, be=be, wh=wh, bh=bh)


@jax.jit
def net_forward_slab(x, prep):
    """x: (B, 450) f32. Returns the packed padded output slab (bp, 512) f32 where
    lanes [0,450) = decoded (sigmoid), lanes [456,459) = enZ (linear); rows >= B are padding.
    Bandwidth-critical consumers should slice this slab at the point of use."""
    B = x.shape[0]
    tb = _pick_batch_tile(B)
    bp = _round_up(B, tb)
    xp = x if bp == B else jnp.pad(x, ((0, bp - B), (0, 0)))   # row pad only; no lane pad/cast

    return pl.pallas_call(
        net_kernel,
        out_shape=jax.ShapeDtypeStruct((bp, HEAD), jnp.float32),
        grid=(bp // tb,),
        in_specs=[
            pl.BlockSpec((tb, IN_DIM), lambda i: (i, 0)),      # x: tiled over batch, raw f32
            pl.BlockSpec((IN_DIM, HID), lambda i: (0, 0)),     # encoder weight: VMEM-resident
            pl.BlockSpec((1, HID), lambda i: (0, 0)),          # encoder bias
            pl.BlockSpec((HID, HEAD), lambda i: (0, 0)),       # fused dec+enZ weight: resident
            pl.BlockSpec((1, HEAD), lambda i: (0, 0)),         # fused bias
        ],
        out_specs=pl.BlockSpec((tb, HEAD), lambda i: (i, 0)),  # single lane-dense output slab
        compiler_params=pltpu.CompilerParams(
            dimension_semantics=("parallel",)),                # megacore-shard batch axis (v7x)
    )(xp, prep["we"], prep["be"], prep["wh"], prep["bh"])


def net_forward(x, prep):
    """Convenience wrapper matching PyTorch Net.forward: returns (enZ (B,3), decoded (B,450))."""
    B = x.shape[0]
    slab = net_forward_slab(x, prep)
    return slab[:B, ENZ_OFF:ENZ_OFF + Z_DIM], slab[:B, :IN_DIM]


def init_params(key):
    """Deterministic init mimicking PyTorch Linear default U(-1/sqrt(fan_in), 1/sqrt(fan_in))."""
    ks = jax.random.split(key, 6)

    def lin(kw, kb, fan_in, fan_out):
        bound = 1.0 / jnp.sqrt(fan_in)
        w = jax.random.uniform(kw, (fan_out, fan_in), jnp.float32, -bound, bound)
        b = jax.random.uniform(kb, (fan_out,), jnp.float32, -bound, bound)
        return w, b

    w_enc, b_enc = lin(ks[0], ks[1], IN_DIM, HID)
    w_z,   b_z   = lin(ks[2], ks[3], HID, Z_DIM)
    w_dec, b_dec = lin(ks[4], ks[5], HID, IN_DIM)
    return dict(w_enc=w_enc, b_enc=b_enc,
                w_z=w_z, b_z=b_z,
                w_dec=w_dec, b_dec=b_dec)


def reference_forward(x, p):
    enc = x @ p["w_enc"].T + p["b_enc"]
    enz = enc @ p["w_z"].T + p["b_z"]
    dec = jax.nn.sigmoid(enc @ p["w_dec"].T + p["b_dec"])
    return enz, dec


if __name__ == "__main__":
    key = jax.random.PRNGKey(0)
    kx, kp = jax.random.split(key)

    B = 8
    x = jax.random.normal(kx, (B, IN_DIM), dtype=jnp.float32)
    params = init_params(kp)
    prep = prepare_params(params)

    enz, dec = net_forward(x, prep)
    jax.block_until_ready((enz, dec))

    # Sanity check against pure-f32 JAX reference (relaxed tolerance: bf16 MXU inputs).
    enz_ref, dec_ref = reference_forward(x, params)
    assert enz.shape == (B, Z_DIM) and dec.shape == (B, IN_DIM)
    assert jnp.allclose(enz, enz_ref, atol=5e-2, rtol=5e-2), \
        float(jnp.max(jnp.abs(enz - enz_ref)))
    assert jnp.allclose(dec, dec_ref, atol=5e-2, rtol=5e-2), \
        float(jnp.max(jnp.abs(dec - dec_ref)))

    print("KERNEL_OK")
</pallas_src>

<mosaic_0001>
module attributes {stable_mosaic.version = 11 : i64} {
  func.func @net_kernel(%arg0: i32, %arg1: memref<16x450xf32, #tpu.memory_space<vmem>>, %arg2: memref<450x256xbf16, #tpu.memory_space<vmem>>, %arg3: memref<1x256xf32, #tpu.memory_space<vmem>>, %arg4: memref<256x512xbf16, #tpu.memory_space<vmem>>, %arg5: memref<1x512xf32, #tpu.memory_space<vmem>>, %arg6: memref<16x512xf32, #tpu.memory_space<vmem>>) attributes {dimension_semantics = [#tpu.dimension_semantics<parallel>], iteration_bounds = array<i64: 1>, scalar_prefetch = 0 : i64, scratch_operands = 0 : i64, tpu.core_type = #tpu.core_type<tc>, window_params = [{transform_indices = @transform_0, window_bounds = array<i64: 16, 450>}, {pipeline_mode = #tpu.pipeline_mode<synchronous>, transform_indices = @transform_1, window_bounds = array<i64: 450, 256>}, {pipeline_mode = #tpu.pipeline_mode<synchronous>, transform_indices = @transform_2, window_bounds = array<i64: 1, 256>}, {pipeline_mode = #tpu.pipeline_mode<synchronous>, transform_indices = @transform_3, window_bounds = array<i64: 256, 512>}, {pipeline_mode = #tpu.pipeline_mode<synchronous>, transform_indices = @transform_4, window_bounds = array<i64: 1, 512>}, {transform_indices = @transform_5, window_bounds = array<i64: 16, 512>}]} {
    %c0 = arith.constant 0 : index
    %c0_0 = arith.constant 0 : index
    %0 = vector.load %arg1[%c0, %c0_0] : memref<16x450xf32, #tpu.memory_space<vmem>>, vector<16x450xf32>
    %1 = arith.truncf %0 : vector<16x450xf32> to vector<16x450xbf16>
    %c0_1 = arith.constant 0 : index
    %c0_2 = arith.constant 0 : index
    %2 = vector.load %arg2[%c0_1, %c0_2] : memref<450x256xbf16, #tpu.memory_space<vmem>>, vector<450x256xbf16>
    %cst = arith.constant dense<0.000000e+00> : vector<16x256xf32>
    %3 = tpu.matmul %1, %2, %cst {dimension_numbers = #tpu.dot_dimension_numbers<[1], [0], [0], [1], [0, 0, 1, 1], [], []>} : vector<16x450xbf16>, vector<450x256xbf16>, vector<16x256xf32> -> vector<16x256xf32>
    %c0_3 = arith.constant 0 : index
    %c0_4 = arith.constant 0 : index
    %4 = vector.load %arg3[%c0_3, %c0_4] : memref<1x256xf32, #tpu.memory_space<vmem>>, vector<1x256xf32>
    %5 = vector.broadcast %4 : vector<1x256xf32> to vector<16x256xf32>
    %6 = arith.addf %3, %5 : vector<16x256xf32>
    %7 = arith.truncf %6 : vector<16x256xf32> to vector<16x256xbf16>
    %c0_5 = arith.constant 0 : index
    %c0_6 = arith.constant 0 : index
    %8 = vector.load %arg4[%c0_5, %c0_6] : memref<256x512xbf16, #tpu.memory_space<vmem>>, vector<256x512xbf16>
    %cst_7 = arith.constant dense<0.000000e+00> : vector<16x512xf32>
    %9 = tpu.matmul %7, %8, %cst_7 {dimension_numbers = #tpu.dot_dimension_numbers<[1], [0], [0], [1], [0, 0, 1, 1], [], []>} : vector<16x256xbf16>, vector<256x512xbf16>, vector<16x512xf32> -> vector<16x512xf32>
    %c0_8 = arith.constant 0 : index
    %c0_9 = arith.constant 0 : index
    %10 = vector.load %arg5[%c0_8, %c0_9] : memref<1x512xf32, #tpu.memory_space<vmem>>, vector<1x512xf32>
    %11 = vector.broadcast %10 : vector<1x512xf32> to vector<16x512xf32>
    %12 = arith.addf %9, %11 : vector<16x512xf32>
    %13 = tpu.iota {dimensions = array<i32: 1>} : vector<16x512xi32>
    %c450_i32 = arith.constant 450 : i32
    %14 = vector.broadcast %c450_i32 : i32 to vector<16x512xi32>
    %15 = arith.cmpi slt, %13, %14 : vector<16x512xi32>
    %16 = arith.negf %12 : vector<16x512xf32>
    %17 = math.exp %16 : vector<16x512xf32>
    %cst_10 = arith.constant 1.000000e+00 : f32
    %18 = vector.broadcast %cst_10 : f32 to vector<16x512xf32>
    %19 = arith.addf %18, %17 : vector<16x512xf32>
    %20 = arith.divf %18, %19 : vector<16x512xf32>
    %21 = arith.select %15, %20, %12 : vector<16x512xi1>, vector<16x512xf32>
    %c0_11 = arith.constant 0 : index
    %c0_12 = arith.constant 0 : index
    %22 = vector.load %arg6[%c0_11, %c0_12] : memref<16x512xf32, #tpu.memory_space<vmem>>, vector<16x512xf32>
    tpu.vector_store %arg6[%c0_11, %c0_12], %21 {strides = array<i32>} : memref<16x512xf32, #tpu.memory_space<vmem>>, vector<16x512xf32>,
    return
  }
  func.func @transform_0(%arg0: i32) -> (i32, i32) {
    %c0_i32 = arith.constant 0 : i32
    %c0_i32_0 = arith.constant 0 : i32
    return %arg0, %c0_i32 : i32, i32
  }
  func.func @transform_1(%arg0: i32) -> (i32, i32) {
    %c0_i32 = arith.constant 0 : i32
    %c0_i32_0 = arith.constant 0 : i32
    %c0_i32_1 = arith.constant 0 : i32
    return %c0_i32, %c0_i32_0 : i32, i32
  }
  func.func @transform_2(%arg0: i32) -> (i32, i32) {
    %c0_i32 = arith.constant 0 : i32
    %c0_i32_0 = arith.constant 0 : i32
    %c0_i32_1 = arith.constant 0 : i32
    return %c0_i32, %c0_i32_0 : i32, i32
  }
  func.func @transform_3(%arg0: i32) -> (i32, i32) {
    %c0_i32 = arith.constant 0 : i32
    %c0_i32_0 = arith.constant 0 : i32
    %c0_i32_1 = arith.constant 0 : i32
    return %c0_i32, %c0_i32_0 : i32, i32
  }
  func.func @transform_4(%arg0: i32) -> (i32, i32) {
    %c0_i32 = arith.constant 0 : i32
    %c0_i32_0 = arith.constant 0 : i32
    %c0_i32_1 = arith.constant 0 : i32
    return %c0_i32, %c0_i32_0 : i32, i32
  }
  func.func @transform_5(%arg0: i32) -> (i32, i32) {
    %c0_i32 = arith.constant 0 : i32
    %c0_i32_0 = arith.constant 0 : i32
    return %arg0, %c0_i32 : i32, i32
  }
}

</mosaic_0001>

<bundles_post_ra>
// kernel: net_forward_slab.1
= control target key start
LH: loop header
LB: loop body
LE: loop exit
PB: predicated region body
PF: predicated region fallthrough
CT: control target
= control target key end

     0   :  { %10 = vsyncpa [#allocation3], 0  ;;  %s1601_s0 = inlined_call_operand.vmem [shape: f32[16,450], index: 0, kind: input, shape index: {}]   ;;  %s1602_s1 = inlined_call_operand.hbm [shape: bf16[450,256], index: 1, kind: input, shape index: {}]   ;;  %s1603_s2 = inlined_call_operand.vmem [shape: f32[1,256], index: 2, kind: input, shape index: {}]   ;;  %s1604_s3 = inlined_call_operand.hbm [shape: bf16[256,512], index: 3, kind: input, shape index: {}]   ;;  %s1605_s4 = inlined_call_operand.vmem [shape: f32[1,512], index: 4, kind: input, shape index: {}]   ;;  %s1606_s5 = inlined_call_operand.hbm [shape: f32[16,512], index: 5, kind: output, shape index: {}]  }
   0x1   :  { %11 = vsyncpa [#allocation6], 0 }
   0x2   :  { %12 = vsyncpa [#allocation4], 0  ;;  %s1519_s18 = smov [#allocation2]  }
   0x3   :  { %s20_s19 = sshll.u32 %s1519_s18, 4  ;;  %s21_s19 = int_to_ptr.vmem [resolvable:$true] %s20_s19 }
   0x4   :  { %s1461_s20 = scalar_lea.vmem %s21_s19, 7296  ;;  %p1466_p1 = scmp.lt.s32.totalorder %s21_s19, %s21_s19 }
   0x5   :  { %p1462_p0 = scmp.ne.s32.totalorder %s21_s19, %s1461_s20  ;;  %p1467_p2 = scmp.lt.s32.totalorder %s1461_s20, %s1461_s20 }
   0x7   :  { %p1468_p3 = por %p1467_p2, %p1466_p1 }
   0x9   :  { %p1469_p4 = pnand %p1468_p3, %p1462_p0 }
   0xb   :  { %1472 = shalt.err (!%p1469_p4)
}
   0xc   :  { %s1520_s21 = smov 128   ;;  %s1521_s22 = smov 8  }
   0xd   :  { %26 = dma.hbm_to_vmem [thread:$0]  %s1602_s1, 7296, %s21_s19, [#allocation3], %s1520_s21, %s1520_s21, %s1521_s22  }
   0xe   :  { %s1522_s25 = smov [#allocation5]  }
   0xf   :  { %s34_s26 = sshll.u32 %s1522_s25, 4  ;;  %s35_s26 = int_to_ptr.vmem [resolvable:$true] %s34_s26 }
  0x10   :  { %s1481_s27 = scalar_lea.vmem %s35_s26, 8192  ;;  %p1486_p6 = scmp.lt.s32.totalorder %s35_s26, %s35_s26 }
  0x11   :  { %p1482_p5 = scmp.ne.s32.totalorder %s35_s26, %s1481_s27  ;;  %p1487_p7 = scmp.lt.s32.totalorder %s1481_s27, %s1481_s27 }
  0x13   :  { %p1488_p8 = por %p1487_p7, %p1486_p6 }
  0x15   :  { %p1489_p9 = pnand %p1488_p8, %p1482_p5 }
  0x17   :  { %1492 = shalt.err (!%p1489_p9)
}
  0x18   :  { %s1523_s28 = smov 256   ;;  %s1524_s29 = smov 16  }
  0x19   :  { %40 = dma.hbm_to_vmem [thread:$0]  %s1604_s3, 8192, %s35_s26, [#allocation6], %s1523_s28, %s1523_s28, %s1524_s29  }
  0x1a   :  { %1513 = dma.done.wait [#allocation3], 7296  }
  0x1b   :  { %1514 = vsyncadd [#allocation3], 4294960000 }
  0x1c   :  { %1515 = dma.done.wait [#allocation6], 8192  }
  0x1d   :  { %1516 = vsyncadd [#allocation6], 4294959104  ;;  %v1239_v0 = vld [vmem:[#allocation2 + $0x74] ss:$8 sps:$4 sm:$0xff]   ;;  %v1241_v1 = vld [vmem:[#allocation2 + $0x70] ss:$8 sps:$4 sm:$0xff]  }
  0x1e   :  { %427 = vmatprep.subr.bf16.mxu0 %v1239_v0  ;;  %v1242_v2 = vld [vmem:[#allocation2 + $0x64] ss:$8 sps:$4 sm:$0xff]   ;;  %v1244_v3 = vld [vmem:[#allocation2 + $0x60] ss:$8 sps:$4 sm:$0xff]   ;;  %v1245_v4 = vld [vmem:[#allocation2 + $0x54] ss:$8 sps:$4 sm:$0xff]  }
  0x1f   :  { %428 = vmatpush1.bf16.msra.mxu0 %v1241_v1  ;;  %v1247_v5 = vld [vmem:[#allocation2 + $0x174] ss:$8 sps:$4 sm:$0xff]   ;;  %v1250_v6 = vld [vmem:[#allocation2 + $0x170] ss:$8 sps:$4 sm:$0xff]   ;;  %v1253_v8 = vld [vmem:[#allocation2 + $0x164] ss:$8 sps:$4 sm:$0xff]  }
  0x20   :  { %429 = vmatprep.subr.bf16.mxu0 %v1242_v2  ;;  %470 = vmatprep.subr.bf16.mxu1 %v1247_v5  ;;  %v1249_v7 = vld [vmem:[#allocation2 + $0x50] ss:$8 sps:$4 sm:$0xff]   ;;  %v1256_v9 = vld [vmem:[#allocation2 + $0x160] ss:$8 sps:$4 sm:$0xff]   ;;  %v1251_v10 = vld [vmem:[#allocation2 + $0x44] ss:$8 sps:$4 sm:$0xff]  }
  0x21   :  { %471 = vmatpush1.bf16.msra.mxu1 %v1250_v6  ;;  %v1259_v11 = vld [vmem:[#allocation2 + $0x154] ss:$8 sps:$4 sm:$0xff]   ;;  %v1255_v12 = vld [vmem:[#allocation2 + $0x40] ss:$8 sps:$4 sm:$0xff]   ;;  %v1262_v13 = vld [vmem:[#allocation2 + $0x150] ss:$8 sps:$4 sm:$0xff]  }
  0x22   :  { %472 = vmatprep.subr.bf16.mxu1 %v1253_v8  ;;  %v1257_v14 = vld [vmem:[#allocation2 + $0x34] ss:$8 sps:$4 sm:$0xff]   ;;  %v1265_v15 = vld [vmem:[#allocation2 + $0x144] ss:$8 sps:$4 sm:$0xff]   ;;  %v1261_v16 = vld [vmem:[#allocation2 + $0x30] ss:$8 sps:$4 sm:$0xff]  }
  0x23   :  { %430 = vmatpush1.bf16.msra.mxu0 %v1244_v3  ;;  %v1263_v17 = vld [vmem:[#allocation2 + $0x24] ss:$8 sps:$4 sm:$0xff]   ;;  %v1268_v18 = vld [vmem:[#allocation2 + $0x140] ss:$8 sps:$4 sm:$0xff]   ;;  %v1271_v19 = vld [vmem:[#allocation2 + $0x134] ss:$8 sps:$4 sm:$0xff]  }
  0x24   :  { %431 = vmatprep.subr.bf16.mxu0 %v1245_v4  ;;  %v1267_v20 = vld [vmem:[#allocation2 + $0x20] ss:$8 sps:$4 sm:$0xff]   ;;  %v1274_v21 = vld [vmem:[#allocation2 + $0x130] ss:$8 sps:$4 sm:$0xff]   ;;  %v1269_v22 = vld [vmem:[#allocation2 + $0x14] ss:$8 sps:$4 sm:$0xff]  }
  0x25   :  { %473 = vmatpush1.bf16.msra.mxu1 %v1256_v9  ;;  %v1277_v23 = vld [vmem:[#allocation2 + $0x124] ss:$8 sps:$4 sm:$0xff]   ;;  %v1273_v24 = vld [vmem:[#allocation2 + $0x10] ss:$8 sps:$4 sm:$0xff]   ;;  %v1280_v26 = vld [vmem:[#allocation2 + $0x120] ss:$8 sps:$4 sm:$0xff]  }
  0x26   :  { %474 = vmatprep.subr.bf16.mxu1 %v1259_v11  ;;  %v1275_v25 = vld [vmem:[#allocation2 + $0x4] ss:$8 sps:$4 sm:$0xff]   ;;  %v1283_v27 = vld [vmem:[#allocation2 + $0x114] ss:$8 sps:$4 sm:$0xff]   ;;  %v1279_v28 = vld [vmem:[#allocation2] ss:$8 sps:$4 sm:$0xff]  }
  0x27   :  { %432 = vmatpush1.bf16.msra.mxu0 %v1249_v7  ;;  %v1281_v29 = vld [vmem:[#allocation2 + $0xf4] ss:$8 sps:$4 sm:$0xff]   ;;  %v1286_v30 = vld [vmem:[#allocation2 + $0x110] ss:$8 sps:$4 sm:$0xff]   ;;  %v1289_v31 = vld [vmem:[#allocation2 + $0x104] ss:$8 sps:$4 sm:$0xff]  }
  0x28   :  { %433 = vmatprep.subr.bf16.mxu0 %v1251_v10  ;;  %v118_v32 = vld [vmem:[#allocation2 + $0x1c0] sm:$0x11]  ;;  %v1285_v33 = vld [vmem:[#allocation2 + $0xf0] ss:$8 sps:$4 sm:$0xff]   ;;  %vm420_vm0 = vcmask 1040384   ;;  %vm416_vm1 = vcmask 539648  }
  0x29   :  { %475 = vmatpush1.bf16.msra.mxu1 %v1262_v13  ;;  %v1292_v34 = vld [vmem:[#allocation2 + $0x100] ss:$8 sps:$4 sm:$0xff]   ;;  %v1287_v35 = vld [vmem:[#allocation2 + $0xe4] ss:$8 sps:$4 sm:$0xff]   ;;  %v1155_v36 = vcombine.high %v118_v32, %v118_v32  ;;  %v1154_v37 = vcombine.low %v118_v32, %v118_v32  ;;  %v1293_v39 = vld [vmem:[#allocation2 + $0xd4] ss:$8 sps:$4 sm:$0xff]  }
  0x2a   :  { %476 = vmatprep.subr.bf16.mxu1 %v1265_v15  ;;  %v1291_v38 = vld [vmem:[#allocation2 + $0xe0] ss:$8 sps:$4 sm:$0xff]   ;;  %v1300_v41 = vld [vmem:[#allocation2 + $0x1b4] ss:$8 sps:$4 sm:$0xff]   ;;  %v1296_v45 = vld [vmem:[#allocation2 + $0xd0] ss:$8 sps:$4 sm:$0xff]  }
  0x2b   :  { %434 = vmatpush1.bf16.msra.mxu0 %v1255_v12  ;;  %v422_v40 = vsel %vm420_vm0, %v1154_v37, 0  ;;  %v53_v42 = vld [vmem:[%s1601_s0 + $0x18] sm:$0xff]  ;;  %v1298_v46 = vld [vmem:[#allocation2 + $0xc4] ss:$8 sps:$4 sm:$0xff]   ;;  %v1302_v52 = vld [vmem:[#allocation2 + $0xc0] ss:$8 sps:$4 sm:$0xff]  }
  0x2c   :  { %435 = vmatprep.subr.bf16.mxu0 %v1257_v14  ;;  %v57_v43 = vld [vmem:[%s1601_s0 + $0x38] sm:$0xff]  ;;  %v51_v48 = vld [vmem:[%s1601_s0 + $0x8] sm:$0xff]  ;;  %v52_v63 = vld [vmem:[%s1601_s0 + $0x10] sm:$0xff] }
  0x2d   :  { %477 = vmatpush1.bf16.msra.mxu1 %v1268_v18  ;;  %v61_v44 = vpack.c.bf16 %v57_v43, %v53_v42  ;;  %v1303_v47 = vld [vmem:[#allocation2 + $0x1b0] ss:$8 sps:$4 sm:$0xff]   ;;  %v55_v49 = vld [vmem:[%s1601_s0 + $0x28] sm:$0xff]  ;;  %v1304_v53 = vld [vmem:[#allocation2 + $0xb4] ss:$8 sps:$4 sm:$0xff]  }
  0x2e   :  { %478 = vmatprep.subr.bf16.mxu1 %v1271_v19  ;;  %v1306_v50 = vld [vmem:[#allocation2 + $0x1a4] ss:$8 sps:$4 sm:$0xff]   ;;  %v59_v51 = vpack.c.bf16 %v55_v49, %v51_v48  ;;  %v1309_v54 = vld [vmem:[#allocation2 + $0x1a0] ss:$8 sps:$4 sm:$0xff]   ;;  %v1312_v55 = vld [vmem:[#allocation2 + $0x194] ss:$8 sps:$4 sm:$0xff]  }
  0x2f   :  { %436 = vmatpush1.bf16.msra.mxu0 %v1261_v16  ;;  %1157 = vmatprep.mubr.msk.bf16.mxu1 %vm416_vm1, %v61_v44  ;;  %v1308_v56 = vld [vmem:[#allocation2 + $0xb0] ss:$8 sps:$4 sm:$0xff]   ;;  %v1310_v57 = vld [vmem:[#allocation2 + $0xa4] ss:$8 sps:$4 sm:$0xff]   ;;  %v1314_v60 = vld [vmem:[#allocation2 + $0xa0] ss:$8 sps:$4 sm:$0xff]  }
  0x30   :  { %437 = vmatprep.subr.bf16.mxu0 %v1263_v17  ;;  %459 = vmatprep.mubr.bf16.mxu0 %v59_v51  ;;  %v1315_v58 = vld [vmem:[#allocation2 + $0x190] ss:$8 sps:$4 sm:$0xff]   ;;  %v1318_v59 = vld [vmem:[#allocation2 + $0x184] ss:$8 sps:$4 sm:$0xff]   ;;  %v1316_v61 = vld [vmem:[#allocation2 + $0x94] ss:$8 sps:$4 sm:$0xff]  }
  0x31   :  { %479 = vmatpush1.bf16.msra.mxu1 %v1274_v21  ;;  %v1321_v62 = vld [vmem:[#allocation2 + $0x180] ss:$8 sps:$4 sm:$0xff]   ;;  %v56_v0 = vld [vmem:[%s1601_s0 + $0x30] sm:$0xff]  ;;  %v1327_v1 = vld [vmem:[#allocation5 + $0xe4] ss:$16 sps:$4 sm:$0xff]  }
  0x32   :  { %480 = vmatprep.subr.bf16.mxu1 %v1277_v23  ;;  %v1320_v2 = vld [vmem:[#allocation2 + $0x90] ss:$8 sps:$4 sm:$0xff]   ;;  %v1322_v3 = vld [vmem:[#allocation2 + $0x84] ss:$8 sps:$4 sm:$0xff]   ;;  %v60_v4 = vpack.c.bf16 %v56_v0, %v52_v63  ;;  %v1324_v7 = vld [vmem:[#allocation2 + $0x80] ss:$8 sps:$4 sm:$0xff]  }
  0x33   :  { %438 = vmatpush1.bf16.msra.mxu0 %v1267_v20  ;;  %v1325_v5 = vld [vmem:[#allocation5 + $0xe0] ss:$16 sps:$4 sm:$0xff]   ;;  %v1333_v6 = vld [vmem:[#allocation5 + $0xc4] ss:$16 sps:$4 sm:$0xff]   ;;  %v50_v8 = vld [vmem:[%s1601_s0] sm:$0xff] }
  0x34   :  { %439 = vmatprep.subr.bf16.mxu0 %v1269_v22  ;;  %v54_v9 = vld [vmem:[%s1601_s0 + $0x20] sm:$0xff]  ;;  %v1331_v11 = vld [vmem:[#allocation5 + $0xc0] ss:$16 sps:$4 sm:$0xff]   ;;  %v1339_v12 = vld [vmem:[#allocation5 + $0xa4] ss:$16 sps:$4 sm:$0xff]  }
  0x35   :  { %481 = vmatpush1.bf16.msra.mxu1 %v1280_v26  ;;  %v1330_v10 = vld [vmem:[#allocation5 + $0xec] ss:$16 sps:$4 sm:$0xff]   ;;  %v58_v13 = vpack.c.bf16 %v54_v9, %v50_v8  ;;  %v1328_v14 = vld [vmem:[#allocation5 + $0xe8] ss:$16 sps:$4 sm:$0xff]   ;;  %v1337_v16 = vld [vmem:[#allocation5 + $0xa0] ss:$16 sps:$4 sm:$0xff]   ;;  %v121_v8 = vlaneseq }
  0x36   :  { %482 = vmatprep.subr.bf16.mxu1 %v1283_v27  ;;  %v1336_v15 = vld [vmem:[#allocation5 + $0xcc] ss:$16 sps:$4 sm:$0xff]   ;;  %v1345_v17 = vld [vmem:[#allocation5 + $0x84] ss:$16 sps:$4 sm:$0xff]   ;;  %v1334_v18 = vld [vmem:[#allocation5 + $0xc8] ss:$16 sps:$4 sm:$0xff]  }
  0x37   :  { %440 = vmatpush1.bf16.msra.mxu0 %v1273_v24  ;;  %v1342_v19 = vld [vmem:[#allocation5 + $0xac] ss:$16 sps:$4 sm:$0xff]   ;;  %v1343_v20 = vld [vmem:[#allocation5 + $0x80] ss:$16 sps:$4 sm:$0xff]   ;;  %v1351_v21 = vld [vmem:[#allocation5 + $0x64] ss:$16 sps:$4 sm:$0xff]  }
  0x38   :  { %441 = vmatprep.subr.bf16.mxu0 %v1275_v25  ;;  %v1340_v22 = vld [vmem:[#allocation5 + $0xa8] ss:$16 sps:$4 sm:$0xff]   ;;  %v1348_v23 = vld [vmem:[#allocation5 + $0x8c] ss:$16 sps:$4 sm:$0xff]   ;;  %v1349_v24 = vld [vmem:[#allocation5 + $0x60] ss:$16 sps:$4 sm:$0xff]  }
  0x39   :  { %483 = vmatpush1.bf16.msra.mxu1 %v1286_v30  ;;  %v1357_v25 = vld [vmem:[#allocation5 + $0x44] ss:$16 sps:$4 sm:$0xff]   ;;  %v1346_v26 = vld [vmem:[#allocation5 + $0x88] ss:$16 sps:$4 sm:$0xff]   ;;  %v1355_v27 = vld [vmem:[#allocation5 + $0x40] ss:$16 sps:$4 sm:$0xff]  }
  0x3a   :  { %484 = vmatprep.subr.bf16.mxu1 %v1289_v31  ;;  %v1352_v30 = vld [vmem:[#allocation5 + $0x68] ss:$16 sps:$4 sm:$0xff]   ;;  %v1361_v31 = vld [vmem:[#allocation5 + $0x20] ss:$16 sps:$4 sm:$0xff]   ;;  %v1360_v32 = vld [vmem:[#allocation5 + $0x4c] ss:$16 sps:$4 sm:$0xff]  }
  0x3b   :  { %442 = vmatpush1.bf16.msra.mxu0 %v1279_v28  ;;  %v1354_v28 = vld [vmem:[#allocation5 + $0x6c] ss:$16 sps:$4 sm:$0xff]   ;;  %v1375_v37 = vld [vmem:[#allocation5 + $0x1e4] ss:$16 sps:$4 sm:$0xff]   ;;  %v1370_v42 = vld [vmem:[#allocation5 + $0x8] ss:$16 sps:$4 sm:$0xff]  }
  0x3c   :  { %443 = vmatprep.subr.bf16.mxu0 %v1281_v29  ;;  %v1363_v29 = vld [vmem:[#allocation5 + $0x24] ss:$16 sps:$4 sm:$0xff]   ;;  %v1379_v43 = vld [vmem:[#allocation5 + $0x1c0] ss:$16 sps:$4 sm:$0xff]   ;;  %v1378_v44 = vld [vmem:[#allocation5 + $0x1ec] ss:$16 sps:$4 sm:$0xff]  }
  0x3d   :  { %485 = vmatpush1.bf16.msra.mxu1 %v1292_v34  ;;  %v1358_v34 = vld [vmem:[#allocation5 + $0x48] ss:$16 sps:$4 sm:$0xff]   ;;  %v1384_v48 = vld [vmem:[#allocation5 + $0x1cc] ss:$16 sps:$4 sm:$0xff]   ;;  %v1393_v49 = vld [vmem:[#allocation5 + $0x184] ss:$16 sps:$4 sm:$0xff]  }
  0x3e   :  { %1156 = vmatprep.subr.msk.bf16.mxu1 %vm420_vm0, %v1155_v36  ;;  %v1366_v36 = vld [vmem:[#allocation5 + $0x2c] ss:$16 sps:$4 sm:$0xff]   ;;  %v1391_v51 = vld [vmem:[#allocation5 + $0x180] ss:$16 sps:$4 sm:$0xff]   ;;  %v1406_v63 = vld [vmem:[#allocation5 + $0x148] ss:$16 sps:$4 sm:$0xff]  }
  0x3f   :  { %444 = vmatpush2.bf16.msra.mxu0 %v1285_v33  ;;  %v1369_v33 = vld [vmem:[#allocation5 + $0x4] ss:$16 sps:$4 sm:$0xff]   ;;  %v122_v9 = vshrl.u32 %v121_v8, 7 }
  0x40   :  { %445 = vmatprep.subr.bf16.mxu0 %v1287_v35  ;;  %v1367_v35 = vld [vmem:[#allocation5] ss:$16 sps:$4 sm:$0xff]   ;;  %v1411_v0 = vld [vmem:[#allocation5 + $0x124] ss:$16 sps:$4 sm:$0xff]  }
  0x41   :  { %493 = vmatpush2.bf16.msra.mxu1 %v422_v40  ;;  %v1372_v40 = vld [vmem:[#allocation5 + $0xc] ss:$16 sps:$4 sm:$0xff]  }
  0x42   :  { %494 = vmatprep.subr.bf16.mxu1 %v1300_v41  ;;  %v1381_v41 = vld [vmem:[#allocation5 + $0x1c4] ss:$16 sps:$4 sm:$0xff]  }
  0x43   :  { %446 = vmatpush2.bf16.msra.mxu0 %v1291_v38  ;;  %v1364_v38 = vld [vmem:[#allocation5 + $0x28] ss:$16 sps:$4 sm:$0xff]  }
  0x44   :  { %447 = vmatprep.subr.bf16.mxu0 %v1293_v39  ;;  %v1373_v39 = vld [vmem:[#allocation5 + $0x1e0] ss:$16 sps:$4 sm:$0xff]  }
  0x45   :  { %495 = vmatpush2.bf16.msra.mxu1 %v1303_v47  ;;  %v1385_v47 = vld [vmem:[#allocation5 + $0x1a0] ss:$16 sps:$4 sm:$0xff]  }
  0x46   :  { %496 = vmatprep.subr.bf16.mxu1 %v1306_v50  ;;  %v1382_v50 = vld [vmem:[#allocation5 + $0x1c8] ss:$16 sps:$4 sm:$0xff]  }
  0x47   :  { %448 = vmatpush2.bf16.msra.mxu0 %v1296_v45  ;;  %v1387_v45 = vld [vmem:[#allocation5 + $0x1a4] ss:$16 sps:$4 sm:$0xff]  }
  0x48   :  { %449 = vmatprep.subr.bf16.mxu0 %v1298_v46  ;;  %v1376_v46 = vld [vmem:[#allocation5 + $0x1e8] ss:$16 sps:$4 sm:$0xff]  }
  0x49   :  { %497 = vmatpush2.bf16.msra.mxu1 %v1309_v54  ;;  %v1396_v54 = vld [vmem:[#allocation5 + $0x18c] ss:$16 sps:$4 sm:$0xff]  }
  0x4a   :  { %498 = vmatprep.subr.bf16.mxu1 %v1312_v55  ;;  %v1394_v55 = vld [vmem:[#allocation5 + $0x188] ss:$16 sps:$4 sm:$0xff]  }
  0x4b   :  { %450 = vmatpush2.bf16.msra.mxu0 %v1302_v52  ;;  %v1390_v52 = vld [vmem:[#allocation5 + $0x1ac] ss:$16 sps:$4 sm:$0xff]  }
  0x4c   :  { %451 = vmatprep.subr.bf16.mxu0 %v1304_v53  ;;  %v1388_v53 = vld [vmem:[#allocation5 + $0x1a8] ss:$16 sps:$4 sm:$0xff]  }
  0x4d   :  { %499 = vmatpush2.bf16.msra.mxu1 %v1315_v58  ;;  %v1400_v58 = vld [vmem:[#allocation5 + $0x168] ss:$16 sps:$4 sm:$0xff]  }
  0x4e   :  { %500 = vmatprep.subr.bf16.mxu1 %v1318_v59  ;;  %v1402_v59 = vld [vmem:[#allocation5 + $0x16c] ss:$16 sps:$4 sm:$0xff]  }
  0x4f   :  { %452 = vmatpush2.bf16.msra.mxu0 %v1308_v56  ;;  %v1397_v56 = vld [vmem:[#allocation5 + $0x160] ss:$16 sps:$4 sm:$0xff]  }
  0x50   :  { %453 = vmatprep.subr.bf16.mxu0 %v1310_v57  ;;  %v1399_v57 = vld [vmem:[#allocation5 + $0x164] ss:$16 sps:$4 sm:$0xff]  }
  0x51   :  { %501 = vmatpush2.bf16.msra.mxu1 %v1321_v62  ;;  %v1403_v62 = vld [vmem:[#allocation5 + $0x140] ss:$16 sps:$4 sm:$0xff]  }
  0x52   :  { %921 = vmatprep.subr.bf16.mxu1 %v1327_v1  ;;  %v1414_v1 = vld [vmem:[#allocation5 + $0x12c] ss:$16 sps:$4 sm:$0xff]  }
  0x53   :  { %454 = vmatpush2.bf16.msra.mxu0 %v1314_v60  ;;  %v1405_v60 = vld [vmem:[#allocation5 + $0x144] ss:$16 sps:$4 sm:$0xff]  }
  0x54   :  { %455 = vmatprep.subr.bf16.mxu0 %v1316_v61  ;;  %503 = vmatmul.mubr.bf16.vlgmr.msra.gmra.mxu1 %v60_v4  ;;  %v1408_v61 = vld [vmem:[#allocation5 + $0x14c] ss:$16 sps:$4 sm:$0xff]   ;;  %v1417_v4 = vld [vmem:[#allocation5 + $0x104] ss:$16 sps:$4 sm:$0xff]  }
  0x55   :  { %922 = vmatpush1.bf16.msra.mxu1 %v1325_v5  ;;  %v1420_v5 = vld [vmem:[#allocation5 + $0x10c] ss:$16 sps:$4 sm:$0xff]  }
  0x56   :  { %923 = vmatprep.subr.bf16.mxu1 %v1333_v6  ;;  %v1415_v6 = vld [vmem:[#allocation5 + $0x100] ss:$16 sps:$4 sm:$0xff]  }
  0x57   :  { %456 = vmatpush2.bf16.msra.mxu0 %v1320_v2  ;;  %v1409_v2 = vld [vmem:[#allocation5 + $0x120] ss:$16 sps:$4 sm:$0xff]  }
  0x58   :  { %457 = vmatprep.subr.bf16.mxu0 %v1322_v3  ;;  %v1412_v3 = vld [vmem:[#allocation5 + $0x128] ss:$16 sps:$4 sm:$0xff]  }
  0x59   :  { %924 = vmatpush1.bf16.msra.mxu1 %v1331_v11  ;;  %v127_v11 = vsub.s32 1, %v122_v9 }
  0x5a   :  { %925 = vmatprep.subr.bf16.mxu1 %v1339_v12  ;;  %v123_v12 = vsub.s32 0, %v122_v9 }
  0x5b   :  { %458 = vmatpush2.bf16.msra.mxu0 %v1324_v7  ;;  %v1418_v7 = vld [vmem:[#allocation5 + $0x108] ss:$16 sps:$4 sm:$0xff]  }
  0x5c   :  { %964 = vmatprep.subr.bf16.mxu0 %v1330_v10 }
  0x5d   :  { %926 = vmatpush1.bf16.msra.mxu1 %v1337_v16 }
  0x5e   :  { %460 = vmatmul.mubr.bf16.vlgmr.msra.gmra.mxu0 %v58_v13  ;;  %927 = vmatprep.subr.bf16.mxu1 %v1345_v17  ;;  %v119_v13 = vld [vmem:[%s1603_s2] sm:$0x3] }
  0x5f   :  { %965 = vmatpush1.bf16.msra.mxu0 %v1328_v14  ;;  %v128_v16 = vrot.slane %v119_v13, %v127_v11  ;;  %v124_v17 = vrot.slane %v119_v13, %v123_v12 }
  0x60   :  { %966 = vmatprep.subr.bf16.mxu0 %v1336_v15 }
  0x61   :  { %928 = vmatpush1.bf16.msra.mxu1 %v1343_v20 }
  0x62   :  { %929 = vmatprep.subr.bf16.mxu1 %v1351_v21 }
  0x63   :  { %967 = vmatpush1.bf16.msra.mxu0 %v1334_v18 }
  0x64   :  { %968 = vmatprep.subr.bf16.mxu0 %v1342_v19 }
  0x65   :  { %930 = vmatpush1.bf16.msra.mxu1 %v1349_v24 }
  0x66   :  { %931 = vmatprep.subr.bf16.mxu1 %v1357_v25 }
  0x67   :  { %969 = vmatpush1.bf16.msra.mxu0 %v1340_v22 }
  0x68   :  { %970 = vmatprep.subr.bf16.mxu0 %v1348_v23 }
  0x69   :  { %932 = vmatpush1.bf16.msra.mxu1 %v1355_v27 }
  0x6a   :  { %933 = vmatprep.subr.bf16.mxu1 %v1363_v29 }
  0x6b   :  { %971 = vmatpush1.bf16.msra.mxu0 %v1346_v26 }
  0x6c   :  { %972 = vmatprep.subr.bf16.mxu0 %v1354_v28 }
  0x6d   :  { %934 = vmatpush1.bf16.msra.mxu1 %v1361_v31 }
  0x6e   :  { %935 = vmatprep.subr.bf16.mxu1 %v1369_v33  ;;  %v591_v33 = vsub.s32 2, %v122_v9 }
  0x6f   :  { %973 = vmatpush1.bf16.msra.mxu0 %v1352_v30 }
  0x70   :  { %974 = vmatprep.subr.bf16.mxu0 %v1360_v32 }
  0x71   :  { %936 = vmatpush1.bf16.msra.mxu1 %v1367_v35  ;;  %v595_v35 = vsub.s32 3, %v122_v9 }
  0x72   :  { %937 = vmatprep.subr.bf16.mxu1 %v1375_v37 }
  0x73   :  { %975 = vmatpush1.bf16.msra.mxu0 %v1358_v34  ;;  %v579_v34 = vld [vmem:[%s1605_s4] sm:$0xf]  ;;  %s1525_s4 = smov [#allocation7]  }
  0x74   :  { %976 = vmatprep.subr.bf16.mxu0 %v1366_v36  ;;  %v584_v36 = vrot.slane %v579_v34, %v123_v12  ;;  %v592_v37 = vrot.slane %v579_v34, %v591_v33  ;;  %s1085_s23 = sshll.u32 %s1525_s4, 4  ;;  %s1086_s23 = int_to_ptr.vmem [resolvable:$true] %s1085_s23 }
  0x75   :  { %938 = vmatpush2.bf16.msra.mxu1 %v1373_v39  ;;  %v596_v39 = vrot.slane %v579_v34, %v595_v35  ;;  %s1493_s24 = scalar_lea.vmem %s1086_s23, 1024  ;;  %p1498_p11 = scmp.lt.s32.totalorder %s1086_s23, %s1086_s23 }
  0x76   :  { %939 = vmatprep.subr.bf16.mxu1 %v1381_v41  ;;  %p1494_p10 = scmp.ne.s32.totalorder %s1086_s23, %s1493_s24  ;;  %p1499_p12 = scmp.lt.s32.totalorder %s1493_s24, %s1493_s24 }
  0x77   :  { %977 = vmatpush1.bf16.msra.mxu0 %v1364_v38  ;;  %v588_v38 = vrot.slane %v579_v34, %v127_v11 }
  0x78   :  { %978 = vmatprep.subr.bf16.mxu0 %v1372_v40  ;;  %p1500_p13 = por %p1499_p12, %p1498_p11 }
  0x79   :  { %940 = vmatpush2.bf16.msra.mxu1 %v1379_v43 }
  0x7a   :  { %941 = vmatprep.subr.bf16.mxu1 %v1387_v45  ;;  %p1501_p0 = pnand %p1500_p13, %p1494_p10 }
  0x7b   :  { %979 = vmatpush1.bf16.msra.mxu0 %v1370_v42 }
  0x7c   :  { %980 = vmatprep.subr.bf16.mxu0 %v1378_v44 }
  0x7d   :  { %942 = vmatpush2.bf16.msra.mxu1 %v1385_v47 }
  0x7e   :  { %943 = vmatprep.subr.bf16.mxu1 %v1393_v49 }
  0x7f   :  { %981 = vmatpush2.bf16.msra.mxu0 %v1376_v46 }
  0x80   :  { %982 = vmatprep.subr.bf16.mxu0 %v1384_v48 }
  0x81   :  { %944 = vmatpush2.bf16.msra.mxu1 %v1391_v51 }
  0x82   :  { %945 = vmatprep.subr.bf16.mxu1 %v1399_v57 }
  0x83   :  { %983 = vmatpush2.bf16.msra.mxu0 %v1382_v50 }
  0x84   :  { %984 = vmatprep.subr.bf16.mxu0 %v1390_v52 }
  0x85   :  { %946 = vmatpush2.bf16.msra.mxu1 %v1397_v56 }
  0x86   :  { %947 = vmatprep.subr.bf16.mxu1 %v1405_v60 }
  0x87   :  { %985 = vmatpush2.bf16.msra.mxu0 %v1388_v53 }
  0x88   :  { %986 = vmatprep.subr.bf16.mxu0 %v1396_v54 }
  0x89   :  { %948 = vmatpush2.bf16.msra.mxu1 %v1403_v62 }
  0x8a   :  { %949 = vmatprep.subr.bf16.mxu1 %v1411_v0 }
  0x8b   :  { %987 = vmatpush2.bf16.msra.mxu0 %v1394_v55 }
  0x8c   :  { %988 = vmatprep.subr.bf16.mxu0 %v1402_v59 }
  0x8d   :  { %950 = vmatpush2.bf16.msra.mxu1 %v1409_v2 }
  0x8e   :  { %951 = vmatprep.subr.bf16.mxu1 %v1417_v4 }
  0x8f   :  { %989 = vmatpush2.bf16.msra.mxu0 %v1400_v58 }
  0x90   :  { %990 = vmatprep.subr.bf16.mxu0 %v1408_v61 }
  0x91   :  { %952 = vmatpush2.bf16.msra.mxu1 %v1415_v6 }
  0x93   :  { %991 = vmatpush2.bf16.msra.mxu0 %v1406_v63 }
  0x94   :  { %992 = vmatprep.subr.bf16.mxu0 %v1414_v1 }
  0x97   :  { %993 = vmatpush2.bf16.msra.mxu0 %v1412_v3 }
  0x98   :  { %994 = vmatprep.subr.bf16.mxu0 %v1420_v5 }
  0x9b   :  { %995 = vmatpush2.bf16.msra.mxu0 %v1418_v7 }
 0x114   :  { %v504_v10 = vpop.f32.mrf.mxu1 }
 0x116   :  { %v506_v14 = vpop.f32.mrf.mxu1 }
 0x118   :  { %v508_v19 = vpop.f32.mrf.mxu1 }
 0x11a   :  { %v510_v26 = vpop.f32.mrf.mxu1 }
 0x11e   :  { %v461_v15 = vpop.f32.mrf.mxu0 }
 0x11f   :  { %v462_v23 = vadd.f32 %v461_v15, %v124_v17 }
 0x120   :  { %v463_v18 = vpop.f32.mrf.mxu0 }
 0x121   :  { %v464_v21 = vadd.f32 %v463_v18, %v128_v16  ;;  %v505_v30 = vadd.f32 %v504_v10, %v462_v23 }
 0x122   :  { %v465_v20 = vpop.f32.mrf.mxu0 }
 0x123   :  { %v466_v22 = vadd.f32 %v465_v20, %v124_v17  ;;  %v507_v28 = vadd.f32 %v506_v14, %v464_v21  ;;  %v1008_v17 = vand.u32 127, %v121_v8 }
 0x124   :  { %v467_v24 = vpop.f32.mrf.mxu0 }
 0x125   :  { %v468_v25 = vadd.f32 %v467_v24, %v128_v16  ;;  %v509_v27 = vadd.f32 %v508_v19, %v466_v22  ;;  %v1011_v18 = vadd.s32 384, %v1008_v17 }
 0x127   :  { %v511_v29 = vadd.f32 %v510_v26, %v468_v25  ;;  %v513_v32 = vpack.c.bf16 %v509_v27, %v505_v30  ;;  %vm1015_vm2 = vcmp.lt.s32.totalorder %v1011_v18, 450 }
 0x129   :  { %v514_v31 = vpack.c.bf16 %v511_v29, %v507_v28 }
 0x12b   :  { %953 = vmatprep.mubr.bf16.mxu1 %v514_v31  ;;  %996 = vmatprep.mubr.bf16.mxu0 %v514_v31 }
 0x12c   :  { %954 = vmatmul.mubr.bf16.vlgmr.msra.gmra.mxu1 %v513_v32  ;;  %997 = vmatmul.mubr.bf16.vlgmr.msra.gmra.mxu0 %v513_v32 }
 0x1ec   :  { %v955_v40 = vpop.f32.mrf.mxu1  ;;  %v998_v41 = vpop.f32.mrf.mxu0 }
 0x1ed   :  { %v956_v42 = vadd.f32 %v955_v40, %v584_v36  ;;  %v999_v43 = vadd.f32 %v998_v41, %v592_v37 }
 0x1ee   :  { %v957_v44 = vpop.f32.mrf.mxu1  ;;  %v1000_v45 = vpop.f32.mrf.mxu0 }
 0x1ef   :  { %v1222_v46 = vmul.f32 -1.442695, %v956_v42  ;;  %v1224_v47 = vmul.f32 -1.442695, %v999_v43  ;;  %v958_v48 = vadd.f32 %v957_v44, %v588_v38  ;;  %v1001_v49 = vadd.f32 %v1000_v45, %v596_v39 }
 0x1f0   :  { %v959_v50 = vpop.f32.mrf.mxu1  ;;  %v1002_v51 = vpop.f32.mrf.mxu0 }
 0x1f1   :  { %1421 = vpow2.f32 %v1222_v46  ;;  %v1223_v52 = vmul.f32 -1.442695, %v958_v48  ;;  %v1225_v53 = vmul.f32 -1.442695, %v1001_v49  ;;  %v960_v54 = vadd.f32 %v959_v50, %v584_v36 }
 0x1f2   :  { %1423 = vpow2.f32 %v1224_v47  ;;  %v1003_v55 = vadd.f32 %v1002_v51, %v592_v37  ;;  %v961_v56 = vpop.f32.mrf.mxu1  ;;  %v1004_v57 = vpop.f32.mrf.mxu0 }
 0x1f3   :  { %1425 = vpow2.f32 %v1223_v52  ;;  %v1226_v58 = vmul.f32 -1.442695, %v960_v54  ;;  %v962_v59 = vadd.f32 %v961_v56, %v588_v38  ;;  %v1005_v60 = vadd.f32 %v1004_v57, %v596_v39 }
 0x1f4   :  { %1427 = vpow2.f32 %v1225_v53  ;;  %v1228_v61 = vmul.f32 -1.442695, %v1003_v55 }
 0x1f5   :  { %1429 = vpow2.f32 %v1226_v58  ;;  %v1227_v62 = vmul.f32 -1.442695, %v962_v59  ;;  %v1229_v63 = vmul.f32 -1.442695, %v1005_v60 }
 0x1f6   :  { %1431 = vpow2.f32 %v1228_v61 }
 0x1f7   :  { %1433 = vpow2.f32 %v1227_v62 }
 0x1f8   :  { %1435 = vpow2.f32 %v1229_v63 }
 0x1fe   :  { %v1422_v0 = vpop.eup %1421 }
 0x1ff   :  { %v1424_v1 = vpop.eup %1423  ;;  %v1040_v2 = vadd.f32 1.0, %v1422_v0 }
 0x200   :  { %v1426_v3 = vpop.eup %1425  ;;  %v1042_v4 = vadd.f32 1.0, %v1424_v1 }
 0x201   :  { %v1428_v5 = vpop.eup %1427  ;;  %1437 = vrcp.f32 %v1040_v2  ;;  %v1041_v6 = vadd.f32 1.0, %v1426_v3 }
 0x202   :  { %v1430_v7 = vpop.eup %1429  ;;  %1439 = vrcp.f32 %v1042_v4  ;;  %v1043_v9 = vadd.f32 1.0, %v1428_v5 }
 0x203   :  { %v1432_v10 = vpop.eup %1431  ;;  %1441 = vrcp.f32 %v1041_v6  ;;  %v1044_v11 = vadd.f32 1.0, %v1430_v7 }
 0x204   :  { %v1434_v12 = vpop.eup %1433  ;;  %1443 = vrcp.f32 %v1043_v9  ;;  %v1046_v13 = vadd.f32 1.0, %v1432_v10 }
 0x205   :  { %v1436_v14 = vpop.eup %1435  ;;  %1445 = vrcp.f32 %v1044_v11  ;;  %v1045_v15 = vadd.f32 1.0, %v1434_v12 }
 0x206   :  { %1447 = vrcp.f32 %v1046_v13  ;;  %v1047_v16 = vadd.f32 1.0, %v1436_v14 }
 0x207   :  { %1449 = vrcp.f32 %v1045_v15 }
 0x208   :  { %1451 = vrcp.f32 %v1047_v16 }
 0x20e   :  { %v1438_v19 = vpop.eup %1437 }
 0x20f   :  { %v1440_v20 = vpop.eup %1439  ;;  %1072 = vst [vmem:[#allocation7] sm:$0xff] %v1438_v19 }
 0x210   :  { %v1442_v21 = vpop.eup %1441  ;;  %1074 = vst [vmem:[#allocation7 + $0x10] sm:$0xff] %v1440_v20 }
 0x211   :  { %v1444_v22 = vpop.eup %1443  ;;  %1073 = vst [vmem:[#allocation7 + $0x8] sm:$0xff] %v1442_v21 }
 0x212   :  { %v1446_v23 = vpop.eup %1445  ;;  %v1067_v24 = vsel %vm1015_vm2, %v1444_v22, %v1001_v49 }
 0x213   :  { %v1448_v25 = vpop.eup %1447  ;;  %1075 = vst [vmem:[#allocation7 + $0x18] sm:$0xff] %v1067_v24  ;;  %1076 = vst [vmem:[#allocation7 + $0x20] sm:$0xff] %v1446_v23 }
 0x214   :  { %v1450_v8 = vpop.eup %1449  ;;  %1078 = vst [vmem:[#allocation7 + $0x30] sm:$0xff] %v1448_v25 }
 0x215   :  { %v1452_v26 = vpop.eup %1451  ;;  %1077 = vst [vmem:[#allocation7 + $0x28] sm:$0xff] %v1450_v8 }
 0x216   :  { %v1071_v27 = vsel %vm1015_vm2, %v1452_v26, %v1005_v60 }
 0x217   :  { %1079 = vst [vmem:[#allocation7 + $0x38] sm:$0xff] %v1071_v27 }
 0x218   :  { %1504 = shalt.err (!%p1501_p0)
}
 0x219   :  { %s1526_s25 = smov 512   ;;  %s1527_s26 = smov 32  }
 0x21a   :  { %1091 = dma.vmem_to_hbm [thread:$0]  %s1086_s23, 1024, %s1606_s5, [#allocation4], %s1526_s25, %s1526_s25, %s1527_s26  }
 0x21b   :  { %1517 = dma.done.wait [#allocation4], 1024  }
 0x21c   :  { %1518 = vsyncadd [#allocation4], 4294966272 }
 0x21d   :  { %1095 = vsyncpa [#allocation3], 1 }
 0x21e   :  { %1096 = vsyncpa [#allocation6], 1 }
 0x21f   :  { %1097 = vsyncpa [#allocation4], 1 }

</bundles_post_ra>
